<compile_context>
chip_gen: v7x
topology: tpu7x:2x2x1
jax: 0.10.0
libtpu: 0.0.40
codegen_flags: <defaults>
</compile_context>

<pallas_src>
import functools
import math

import numpy as np
import jax
import jax.numpy as jnp
from jax import lax
from jax.experimental import pallas as pl
from jax.experimental.pallas import tpu as pltpu


# ---------------------------------------------------------------------------
# Host-side helpers (build / trace time only).
# ---------------------------------------------------------------------------

def _butterfly_matrix(v_len: int, d_v: int) -> np.ndarray:
    """Replicates SWD.get_butterfly_matrix. Used only by the pure-JAX reference."""
    len_sort_window = 2
    cols = [np.arange(v_len)]
    shift_offset = 0
    while len(cols) < d_v:
        for _ in range(int(math.log(v_len, 2))):
            a = np.arange(v_len)
            if shift_offset == 0:
                col = a                      # torch: cat([a[-0:], a[:-0]]) == a
            else:
                col = np.concatenate([a[-shift_offset:], a[:-shift_offset]])
            shift_offset = (shift_offset + len_sort_window) % v_len
            cols.append(col)
            if len(cols) == d_v:
                break
    return np.stack(cols).T.astype(np.int32)  # (v_len, d_v)


def _column_shifts_ref(v_len: int, d_v: int) -> np.ndarray:
    """Per-column circular shifts implied by get_butterfly_matrix (O(d_v) host sim)."""
    shifts = [0]
    off = 0
    while len(shifts) < d_v:
        for _ in range(int(math.log(v_len, 2))):
            shifts.append(off)
            off = (off + 2) % v_len
            if len(shifts) == d_v:
                break
    return np.asarray(shifts, dtype=np.int32)


def _choose_tiling(B: int, L: int, Dp: int, itemsize: int,
                   target_block_bytes: int = 2 * 1024 * 1024):
    """Pick (batch rows per block, lane tile). Full L always stays in-block."""
    # Lane (feature) tile: largest multiple of 128 dividing Dp that keeps one
    # (L, d_tile) row under the target; D is the only VMEM relief valve.
    if Dp >= 128 and Dp % 128 == 0:
        q = Dp // 128
        g = 1
        for cand in range(q, 0, -1):
            if q % cand == 0 and L * 128 * cand * itemsize <= target_block_bytes:
                g = cand
                break
        d_tile = 128 * g
    else:  # defensive; wrapper pads Dp to a multiple of 128
        d_tile = Dp
    row_bytes = L * d_tile * itemsize
    # Batch rows per block: bounded unroll (<= 8) so regalloc stays clean.
    bb = max(1, min(8, B, target_block_bytes // max(row_bytes, 1)))
    while B % bb:
        bb -= 1

    # Keep the grid deep enough (>= 8 steps when possible) so the software
    # pipeline can hide HBM<->VMEM traffic on both TensorCores.
    def steps(b):
        return (B // b) * (Dp // d_tile)

    while bb > 1 and steps(bb) < 8:
        nb = bb - 1
        while B % nb:
            nb -= 1
        bb = nb
    return bb, d_tile


@functools.lru_cache(maxsize=None)
def _strided_roll_supported(dtype_name: str) -> bool:
    """Probe pltpu.roll(..., stride=2, stride_axis=1) once: it must equal a
    per-column np.roll by (L-2 + 2*j) % L. Any lowering error or convention
    mismatch -> fall back to the barrel shifter."""
    L, D = 16, 128
    base = (np.arange(L)[:, None] * 16 + (np.arange(D)[None, :] % 8)).astype(np.float64)
    expect = np.stack([np.roll(base[:, j], (L - 2 + 2 * j) % L) for j in range(D)],
                      axis=1)

    def kern(x_ref, o_ref):
        o_ref[...] = pltpu.roll(x_ref[...], shift=L - 2, axis=0,
                                stride=2, stride_axis=1)

    try:
        x = jnp.asarray(base).astype(dtype_name)
        got = pl.pallas_call(
            kern,
            out_shape=jax.ShapeDtypeStruct((L, D), x.dtype),
            grid=(1,),
            in_specs=[pl.BlockSpec((L, D), lambda i: (0, 0))],
            out_specs=pl.BlockSpec((L, D), lambda i: (0, 0)),
        )(x)
        return bool(np.array_equal(np.asarray(got).astype(np.float64), expect))
    except Exception:
        return False


# ---------------------------------------------------------------------------
# Kernel.
# ---------------------------------------------------------------------------

def _make_swd_kernel(block_b: int, seq_len: int, d_tile: int,
                     descending: bool, use_strided: bool):
    L = seq_len
    n_shift_bits = (L - 1).bit_length()        # all shifts are even and < L

    def kernel(v_ref, o_ref):
        dj = pl.program_id(1)
        # Global feature (column) index of this lane tile; per-column shift is
        # s_j = 0 (j==0) else (2*(j-1)) % L.  Masks are built once per grid
        # step, outside the batch-row loop.
        col = dj * d_tile + lax.broadcasted_iota(jnp.int32, (1, d_tile), 1)
        even_row = (lax.broadcasted_iota(jnp.int32, (L, d_tile), 0) % 2) == 0
        if use_strided:
            col0 = col == 0
        else:
            shifts_row = jnp.where(col == 0, 0, (2 * (col - 1)) % L)   # (1, d_tile)
            bit_masks = [((shifts_row >> k) & 1) == 1
                         for k in range(1, n_shift_bits)]

        for bi in range(block_b):
            v = v_ref[bi]                                              # (L, d_tile)
            # (a) adjacent-pair sort: even row i pairs with i+1, odd with i-1.
            up = pltpu.roll(v, shift=L - 1, axis=0)                    # v[(i+1)%L]
            down = pltpu.roll(v, shift=1, axis=0)                      # v[(i-1)%L]
            if descending:
                combined = jnp.where(even_row, jnp.maximum(v, up),
                                     jnp.minimum(v, down))
            else:
                combined = jnp.where(even_row, jnp.minimum(v, up),
                                     jnp.maximum(v, down))
            # (b) per-column circular shift: out[i, j] = combined[(i - s_j) % L, j].
            if use_strided:
                # One XLU roll: column j gets amount (L-2) + 2j == 2*(j-1) mod L;
                # column 0 (shift 0) fixed up with a single select.
                rolled = pltpu.roll(combined, shift=(L - 2) % L, axis=0,
                                    stride=2, stride_axis=1)
                acc = jnp.where(col0, combined, rolled)
            else:
                # Barrel shifter: O(log2 L) static rolls + masked selects.
                # Bit 0 is skipped (all shifts are even).
                acc = combined
                for k, m in zip(range(1, n_shift_bits), bit_masks):
                    acc = jnp.where(m, pltpu.roll(acc, shift=1 << k, axis=0), acc)
            o_ref[bi] = acc.astype(o_ref.dtype)

    return kernel


# ---------------------------------------------------------------------------
# Wrapper.
# ---------------------------------------------------------------------------

@functools.lru_cache(maxsize=None)
def _get_swd_fn(B: int, L: int, D: int, dtype_name: str, descending: bool):
    assert L >= 2 and L % 2 == 0, "len_sort_window=2 requires an even v_len"

    # Validate the closed-form per-column shifts against the module's
    # construction (host side, O(D)).
    shifts = _column_shifts_ref(L, D)
    j = np.arange(D)
    closed = np.where(j == 0, 0, (2 * (j - 1)) % L).astype(np.int32)
    assert np.array_equal(shifts, closed), \
        "closed-form shift formula must match the butterfly construction"
    assert np.all(shifts % 2 == 0), "len_sort_window=2 implies even shifts"

    dtype = np.dtype(dtype_name)
    itemsize = dtype.itemsize
    # Pad D to a multiple of 128 so output stores are lane-dense (measured as
    # the biggest single store-path lever); padded columns are sliced off.
    Dp = D if D % 128 == 0 else ((D + 127) // 128) * 128
    bb, d_tile = _choose_tiling(B, L, Dp, itemsize)
    n_d_blocks = Dp // d_tile
    # Strided roll needs a static base shift, so use it only when the lane
    # tile covers all of D; the barrel shifter handles tiled-D (its masks use
    # the dynamic global column index).
    use_strided = (n_d_blocks == 1) and _strided_roll_supported(dtype_name)

    kernel = _make_swd_kernel(bb, L, d_tile, descending, use_strided)
    grid = (B // bb, n_d_blocks)
    # The padded temp is jit-internal, so in-place aliasing is free; without
    # padding the input is a jit parameter and aliasing could force a copy.
    io_alias = {0: 0} if Dp != D else {}

    call = pl.pallas_call(
        kernel,
        out_shape=jax.ShapeDtypeStruct((B, L, Dp), dtype),
        grid=grid,
        in_specs=[pl.BlockSpec((bb, L, d_tile), lambda b, d: (b, 0, d))],
        out_specs=pl.BlockSpec((bb, L, d_tile), lambda b, d: (b, 0, d)),
        input_output_aliases=io_alias,
        compiler_params=pltpu.CompilerParams(
            dimension_semantics=("parallel", "parallel")),
    )

    def run(v):
        x = v if Dp == D else jnp.pad(v, ((0, 0), (0, 0), (0, Dp - D)))
        out = call(x)
        return out if Dp == D else out[:, :, :D]

    return jax.jit(run)


def swd_pallas(v, descending: bool = False):
    B, L, D = v.shape
    fn = _get_swd_fn(int(B), int(L), int(D), np.dtype(v.dtype).name, bool(descending))
    return fn(v)


def swd_reference(v, descending: bool = False):
    """Pure-JAX port of SWD.forward (padding_mask=None, src_lengths=None)."""
    B, L, D = v.shape
    bm = jnp.asarray(_butterfly_matrix(L, D))                         # (L, D)
    idx = jnp.broadcast_to(bm[None], (B, L, D))
    v_shifted = jnp.take_along_axis(v, idx, axis=1)                   # gather dim=1
    v_shifted = v_shifted.reshape(B, L // 2, 2, D)
    v_sorted = jnp.sort(v_shifted, axis=2)
    if descending:
        v_sorted = jnp.flip(v_sorted, axis=2)
    return v_sorted.reshape(B, L, D)


if __name__ == "__main__":
    key = jax.random.PRNGKey(0)
    B, L, D = 2, 16, 32                       # (batch, v_len, d_v)
    v = jax.random.normal(key, (B, L, D), dtype=jnp.float32)

    out = swd_pallas(v)
    jax.block_until_ready(out)
    ref = swd_reference(v)
    assert out.shape == ref.shape and out.dtype == ref.dtype
    assert jnp.allclose(out, ref, atol=1e-6), float(jnp.max(jnp.abs(out - ref)))

    out_d = swd_pallas(v, descending=True)
    jax.block_until_ready(out_d)
    ref_d = swd_reference(v, descending=True)
    assert jnp.allclose(out_d, ref_d, atol=1e-6), float(jnp.max(jnp.abs(out_d - ref_d)))

    print("KERNEL_OK")
</pallas_src>

<mosaic_0001>
module attributes {stable_mosaic.version = 11 : i64} {
  func.func @kern(%arg0: i32, %arg1: memref<16x128xf32, #tpu.memory_space<vmem>>, %arg2: memref<16x128xf32, #tpu.memory_space<vmem>>) attributes {dimension_semantics = [#tpu.dimension_semantics<arbitrary>], iteration_bounds = array<i64: 1>, scalar_prefetch = 0 : i64, scratch_operands = 0 : i64, tpu.core_type = #tpu.core_type<tc>, window_params = [{pipeline_mode = #tpu.pipeline_mode<synchronous>, transform_indices = @transform_0, window_bounds = array<i64: 16, 128>}, {pipeline_mode = #tpu.pipeline_mode<synchronous>, transform_indices = @transform_1, window_bounds = array<i64: 16, 128>}]} {
    %c0 = arith.constant 0 : index
    %c0_0 = arith.constant 0 : index
    %0 = vector.load %arg1[%c0, %c0_0] : memref<16x128xf32, #tpu.memory_space<vmem>>, vector<16x128xf32>
    %c14_i32 = arith.constant 14 : i32
    %1 = tpu.dynamic_rotate %0 by %c14_i32 dim 0 {stride = 2 : si32, stride_dimension = 1 : si32} : vector<16x128xf32>, i32 -> vector<16x128xf32>
    %c0_1 = arith.constant 0 : index
    %c0_2 = arith.constant 0 : index
    %2 = vector.load %arg2[%c0_1, %c0_2] : memref<16x128xf32, #tpu.memory_space<vmem>>, vector<16x128xf32>
    tpu.vector_store %arg2[%c0_1, %c0_2], %1 {strides = array<i32>} : memref<16x128xf32, #tpu.memory_space<vmem>>, vector<16x128xf32>,
    return
  }
  func.func @transform_0(%arg0: i32) -> (i32, i32) {
    %c0_i32 = arith.constant 0 : i32
    %c0_i32_0 = arith.constant 0 : i32
    %c0_i32_1 = arith.constant 0 : i32
    return %c0_i32, %c0_i32_0 : i32, i32
  }
  func.func @transform_1(%arg0: i32) -> (i32, i32) {
    %c0_i32 = arith.constant 0 : i32
    %c0_i32_0 = arith.constant 0 : i32
    %c0_i32_1 = arith.constant 0 : i32
    return %c0_i32, %c0_i32_0 : i32, i32
  }
}

module attributes {stable_mosaic.version = 11 : i64} {
  func.func @kernel(%arg0: i32, %arg1: i32, %arg2: memref<1x16x128xf32, #tpu.memory_space<vmem>>, %arg3: memref<1x16x128xf32, #tpu.memory_space<vmem>>) attributes {dimension_semantics = [#tpu.dimension_semantics<parallel>, #tpu.dimension_semantics<parallel>], iteration_bounds = array<i64: 2, 1>, scalar_prefetch = 0 : i64, scratch_operands = 0 : i64, tpu.core_type = #tpu.core_type<tc>, window_params = [{transform_indices = @transform_0, window_bounds = array<i64: 1, 16, 128>}, {transform_indices = @transform_1, window_bounds = array<i64: 1, 16, 128>}]} {
    %c128_i32 = arith.constant 128 : i32
    %0 = arith.muli %arg1, %c128_i32 : i32
    %1 = tpu.iota {dimensions = array<i32: 1>} : vector<1x128xi32>
    %2 = vector.broadcast %0 : i32 to vector<1x128xi32>
    %3 = arith.addi %2, %1 : vector<1x128xi32>
    %4 = tpu.iota {dimensions = array<i32: 0>} : vector<16x128xi32>
    %c2_i32 = arith.constant 2 : i32
    %c0_i32 = arith.constant 0 : i32
    %5 = arith.cmpi eq, %c2_i32, %c0_i32 : i32
    %c1_i32 = arith.constant 1 : i32
    %6 = arith.select %5, %c1_i32, %c2_i32 : i32
    %7 = vector.broadcast %6 : i32 to vector<16x128xi32>
    %8 = arith.remsi %4, %7 : vector<16x128xi32>
    %c0_i32_0 = arith.constant 0 : i32
    %9 = vector.broadcast %c0_i32_0 : i32 to vector<16x128xi32>
    %10 = arith.cmpi ne, %8, %9 : vector<16x128xi32>
    %c0_i32_1 = arith.constant 0 : i32
    %11 = vector.broadcast %c0_i32_1 : i32 to vector<16x128xi32>
    %12 = arith.cmpi slt, %8, %11 : vector<16x128xi32>
    %c0_i32_2 = arith.constant 0 : i32
    %13 = arith.cmpi slt, %6, %c0_i32_2 : i32
    %14 = vector.broadcast %13 : i1 to vector<16x128xi1>
    %15 = vector.broadcast %14 : vector<16x128xi1> to vector<16x128xi1>
    %16 = arith.xori %12, %15 : vector<16x128xi1>
    %17 = arith.andi %16, %10 : vector<16x128xi1>
    %18 = vector.broadcast %6 : i32 to vector<16x128xi32>
    %19 = arith.addi %8, %18 : vector<16x128xi32>
    %20 = arith.select %17, %19, %8 : vector<16x128xi1>, vector<16x128xi32>
    %c0_i32_3 = arith.constant 0 : i32
    %21 = vector.broadcast %c0_i32_3 : i32 to vector<16x128xi32>
    %22 = arith.cmpi eq, %20, %21 : vector<16x128xi32>
    %c0_i32_4 = arith.constant 0 : i32
    %23 = vector.broadcast %c0_i32_4 : i32 to vector<1x128xi32>
    %24 = arith.cmpi eq, %3, %23 : vector<1x128xi32>
    %c1_i32_5 = arith.constant 1 : i32
    %25 = vector.broadcast %c1_i32_5 : i32 to vector<1x128xi32>
    %26 = arith.subi %3, %25 : vector<1x128xi32>
    %c2_i32_6 = arith.constant 2 : i32
    %27 = vector.broadcast %c2_i32_6 : i32 to vector<1x128xi32>
    %28 = arith.muli %27, %26 : vector<1x128xi32>
    %c16_i32 = arith.constant 16 : i32
    %c0_i32_7 = arith.constant 0 : i32
    %29 = arith.cmpi eq, %c16_i32, %c0_i32_7 : i32
    %c1_i32_8 = arith.constant 1 : i32
    %30 = arith.select %29, %c1_i32_8, %c16_i32 : i32
    %31 = vector.broadcast %30 : i32 to vector<1x128xi32>
    %32 = arith.remsi %28, %31 : vector<1x128xi32>
    %c0_i32_9 = arith.constant 0 : i32
    %33 = vector.broadcast %c0_i32_9 : i32 to vector<1x128xi32>
    %34 = arith.cmpi ne, %32, %33 : vector<1x128xi32>
    %c0_i32_10 = arith.constant 0 : i32
    %35 = vector.broadcast %c0_i32_10 : i32 to vector<1x128xi32>
    %36 = arith.cmpi slt, %32, %35 : vector<1x128xi32>
    %c0_i32_11 = arith.constant 0 : i32
    %37 = arith.cmpi slt, %30, %c0_i32_11 : i32
    %38 = vector.broadcast %37 : i1 to vector<1x128xi1>
    %39 = vector.broadcast %38 : vector<1x128xi1> to vector<1x128xi1>
    %40 = arith.xori %36, %39 : vector<1x128xi1>
    %41 = arith.andi %40, %34 : vector<1x128xi1>
    %42 = vector.broadcast %30 : i32 to vector<1x128xi32>
    %43 = arith.addi %32, %42 : vector<1x128xi32>
    %44 = arith.select %41, %43, %32 : vector<1x128xi1>, vector<1x128xi32>
    %c0_i32_12 = arith.constant 0 : i32
    %45 = vector.broadcast %c0_i32_12 : i32 to vector<1x128xi32>
    %46 = arith.select %24, %45, %44 : vector<1x128xi1>, vector<1x128xi32>
    %c1_i32_13 = arith.constant 1 : i32
    %47 = vector.broadcast %c1_i32_13 : i32 to vector<1x128xi32>
    %48 = arith.shrsi %46, %47 : vector<1x128xi32>
    %c1_i32_14 = arith.constant 1 : i32
    %49 = vector.broadcast %c1_i32_14 : i32 to vector<1x128xi32>
    %50 = arith.andi %48, %49 : vector<1x128xi32>
    %c1_i32_15 = arith.constant 1 : i32
    %51 = vector.broadcast %c1_i32_15 : i32 to vector<1x128xi32>
    %52 = arith.cmpi eq, %50, %51 : vector<1x128xi32>
    %c2_i32_16 = arith.constant 2 : i32
    %53 = vector.broadcast %c2_i32_16 : i32 to vector<1x128xi32>
    %54 = arith.shrsi %46, %53 : vector<1x128xi32>
    %c1_i32_17 = arith.constant 1 : i32
    %55 = vector.broadcast %c1_i32_17 : i32 to vector<1x128xi32>
    %56 = arith.andi %54, %55 : vector<1x128xi32>
    %c1_i32_18 = arith.constant 1 : i32
    %57 = vector.broadcast %c1_i32_18 : i32 to vector<1x128xi32>
    %58 = arith.cmpi eq, %56, %57 : vector<1x128xi32>
    %c3_i32 = arith.constant 3 : i32
    %59 = vector.broadcast %c3_i32 : i32 to vector<1x128xi32>
    %60 = arith.shrsi %46, %59 : vector<1x128xi32>
    %c1_i32_19 = arith.constant 1 : i32
    %61 = vector.broadcast %c1_i32_19 : i32 to vector<1x128xi32>
    %62 = arith.andi %60, %61 : vector<1x128xi32>
    %c1_i32_20 = arith.constant 1 : i32
    %63 = vector.broadcast %c1_i32_20 : i32 to vector<1x128xi32>
    %64 = arith.cmpi eq, %62, %63 : vector<1x128xi32>
    %c0 = arith.constant 0 : index
    %c0_21 = arith.constant 0 : index
    %c0_22 = arith.constant 0 : index
    %65 = vector.load %arg2[%c0, %c0_21, %c0_22] : memref<1x16x128xf32, #tpu.memory_space<vmem>>, vector<1x16x128xf32>
    %66 = vector.shape_cast %65 : vector<1x16x128xf32> to vector<16x128xf32>
    %c15_i32 = arith.constant 15 : i32
    %67 = tpu.dynamic_rotate %66 by %c15_i32 dim 0 : vector<16x128xf32>, i32 -> vector<16x128xf32>
    %c1_i32_23 = arith.constant 1 : i32
    %68 = tpu.dynamic_rotate %66 by %c1_i32_23 dim 0 : vector<16x128xf32>, i32 -> vector<16x128xf32>
    %69 = arith.minimumf %66, %67 : vector<16x128xf32>
    %70 = arith.maximumf %66, %68 : vector<16x128xf32>
    %71 = arith.select %22, %69, %70 : vector<16x128xi1>, vector<16x128xf32>
    %c2_i32_24 = arith.constant 2 : i32
    %72 = tpu.dynamic_rotate %71 by %c2_i32_24 dim 0 : vector<16x128xf32>, i32 -> vector<16x128xf32>
    %73 = vector.shape_cast %52 : vector<1x128xi1> to vector<1x128xi1>
    %74 = vector.broadcast %73 : vector<1x128xi1> to vector<16x128xi1>
    %75 = arith.select %74, %72, %71 : vector<16x128xi1>, vector<16x128xf32>
    %c4_i32 = arith.constant 4 : i32
    %76 = tpu.dynamic_rotate %75 by %c4_i32 dim 0 : vector<16x128xf32>, i32 -> vector<16x128xf32>
    %77 = vector.shape_cast %58 : vector<1x128xi1> to vector<1x128xi1>
    %78 = vector.broadcast %77 : vector<1x128xi1> to vector<16x128xi1>
    %79 = arith.select %78, %76, %75 : vector<16x128xi1>, vector<16x128xf32>
    %c8_i32 = arith.constant 8 : i32
    %80 = tpu.dynamic_rotate %79 by %c8_i32 dim 0 : vector<16x128xf32>, i32 -> vector<16x128xf32>
    %81 = vector.shape_cast %64 : vector<1x128xi1> to vector<1x128xi1>
    %82 = vector.broadcast %81 : vector<1x128xi1> to vector<16x128xi1>
    %83 = arith.select %82, %80, %79 : vector<16x128xi1>, vector<16x128xf32>
    %c0_25 = arith.constant 0 : index
    %c0_26 = arith.constant 0 : index
    %c0_27 = arith.constant 0 : index
    %84 = vector.load %arg3[%c0_25, %c0_26, %c0_27] : memref<1x16x128xf32, #tpu.memory_space<vmem>>, vector<1x16x128xf32>
    %85 = vector.shape_cast %84 : vector<1x16x128xf32> to vector<16x128xf32>
    %86 = vector.shape_cast %83 : vector<16x128xf32> to vector<1x16x128xf32>
    tpu.vector_store %arg3[%c0_25, %c0_26, %c0_27], %86 {strides = array<i32>} : memref<1x16x128xf32, #tpu.memory_space<vmem>>, vector<1x16x128xf32>,
    return
  }
  func.func @transform_0(%arg0: i32, %arg1: i32) -> (i32, i32, i32) {
    %c0_i32 = arith.constant 0 : i32
    %c0_i32_0 = arith.constant 0 : i32
    return %arg0, %c0_i32, %arg1 : i32, i32, i32
  }
  func.func @transform_1(%arg0: i32, %arg1: i32) -> (i32, i32, i32) {
    %c0_i32 = arith.constant 0 : i32
    %c0_i32_0 = arith.constant 0 : i32
    return %arg0, %c0_i32, %arg1 : i32, i32, i32
  }
}

</mosaic_0001>

<bundles_post_ra>
// kernel: run.1
= control target key start
LH: loop header
LB: loop body
LE: loop exit
PB: predicated region body
PF: predicated region fallthrough
CT: control target
= control target key end

     0   :  { %s405_s6 = smov 0   ;;  %s407_s7 = smov 0   ;;  %s453_s0 = inlined_call_operand.vmem [shape: f32[2,16,128], index: 0, kind: input, shape index: {}, may-alias: {0,1}]   ;;  %s454_s1 = inlined_call_operand.vmem [shape: f32[2,16,128], index: 1, kind: output, shape index: {}, may-alias: {0,1}]  }
   0x1   :  { %s409_s8 = smov 0  }
   0x2 LB: > { %s23_s9 = sadd.s32 1, %s389_s7  ;;  %p336_p0 = scmp.ge.s32.totalorder %s393_s8, 1  ;;  %s393_s8 = sphi %s409_s8, %s11_s8   ;;  %s389_s7 = sphi %s407_s7, %s456_s7   ;;  %s385_s6 = sphi %s405_s6, %s455_s6  }
   0x3   : > { %p25_p1 = scmp.ge.s32.totalorder %s23_s9, 2  ;;  %p106_p2 = scmp.lt.s32.totalorder %s393_s8, 3 }
   0x5   : > { %s458_s9 = smov (%p25_p1, %s23_s9), 0  ;;  %p107_p3 = pnand %p336_p0, %p106_p2 }
   0x6   : > { %p132_p4 = scmp.lt.s32.totalorder (!%p107_p3), %s385_s6, 1  ;;  %v149_v0 = vlaneseq (!%p107_p3) }
   0x7   : > { %110 = sbr.rel (%p107_p3) target bundleno = 41 (0x29), region = 24 }
   0x8   : > { %v150_v1 = vand.u32 (!%p107_p3), 127, %v149_v0  ;;  %v425_v2 = vshrl.u32 (!%p107_p3), %v149_v0, 7 }
   0xa   : > { %v155_v3 = vadd.s32 (!%p107_p3), 8, %v425_v2  ;;  %v341_v4 = vadd.s32 (!%p107_p3), 4294967295, %v150_v1  ;;  %vm211_vm0 = vcmp.lt.s32.totalorder (!%p107_p3), %v425_v2, 7  ;;  %vm216_vm1 = vcmp.lt.s32.totalorder (!%p107_p3), %v425_v2, 1 }
   0xb   : > { %v160_v12 = vand.u32 (!%p107_p3), 1, %v425_v2  ;;  %vm182_vm5 = vcmp.eq.s32.totalorder (!%p107_p3), %v150_v1, 0  ;;  %vm227_vm9 = vcmp.lt.s32.totalorder (!%p107_p3), %v425_v2, 2  ;;  %vm236_vm11 = vcmp.lt.s32.totalorder (!%p107_p3), %v425_v2, 4 }
   0xc   : > { %v184_v5 = vmul.u32 (!%p107_p3), 2, %v341_v4  ;;  %v167_v13 = vand.u32 (!%p107_p3), 1, %v155_v3 }
   0xd   : > { %vm180_vm2 = vcmp.eq.s32.totalorder (!%p107_p3), %v160_v12, 0 }
   0xe   : > { %s460_s6 = smov (!%p132_p4, %s385_s6), 1  ;;  %v186_v14 = vsub.s32 0, %v184_v5  ;;  %vm181_vm3 = vcmp.eq.s32.totalorder %v167_v13, 0  ;;  %vm185_vm4 = vcmp.lt.s32.totalorder %v184_v5, 0 }
   0xf   : > { %s345_s10 = sshll.u32 %s460_s6, 4 }
  0x10   : > { %s139_s13 = scalar_lea.vmem %s453_s0, %s345_s10  ;;  %v342_v19 = vmin.u32 %v186_v14, %v184_v5  ;;  %s147_s16 = scalar_lea.vmem %s454_s1, %s345_s10 }
  0x11   : > { %v207_v6 = vld [vmem:[%s139_s13] sm:$0xff]  ;;  %v208_v7 = vld [vmem:[%s139_s13 + $0x8] sm:$0xff] }
  0x12   : > { %v209_v8 = vrot.slane %v207_v6, 1  ;;  %v210_v9 = vrot.slane %v208_v7, 1  ;;  %v214_v10 = vrot.slane %v207_v6, 7  ;;  %v215_v11 = vrot.slane %v208_v7, 7 }
  0x13   : > { %v189_v21 = vand.u32 15, %v342_v19 }
  0x14   : > { %v212_v15 = vsel %vm211_vm0, %v209_v8, %v210_v9  ;;  %v213_v16 = vsel %vm211_vm0, %v210_v9, %v209_v8  ;;  %v217_v17 = vsel %vm216_vm1, %v214_v10, %v215_v11  ;;  %v218_v18 = vsel %vm216_vm1, %v215_v11, %v214_v10 }
  0x15   : > { %v219_v20 = vmin.f32 %v207_v6, %v212_v15  ;;  %v220_v22 = vmin.f32 %v208_v7, %v213_v16  ;;  %v221_v23 = vmax.f32 %v207_v6, %v218_v18  ;;  %v222_v24 = vmax.f32 %v208_v7, %v217_v17 }
  0x16   : > { %v190_v25 = vsub.s32 0, %v189_v21 }
  0x17   : > { %v223_v27 = vsel %vm180_vm2, %v219_v20, %v221_v23  ;;  %v224_v28 = vsel %vm181_vm3, %v220_v22, %v222_v24 }
  0x18   : > { %v191_v26 = vsel %vm185_vm4, %v190_v25, %v189_v21  ;;  %v225_v31 = vrot.slane %v223_v27, 6  ;;  %v226_v32 = vrot.slane %v224_v28, 6 }
  0x19   : > { %vm192_vm6 = vcmp.ne.s32.totalorder %v191_v26, 0  ;;  %vm193_vm7 = vcmp.lt.s32.totalorder %v191_v26, 0  ;;  %v195_v29 = vadd.s32 16, %v191_v26 }
  0x1a   : > { %vm194_vm8 = vmand %vm193_vm7, %vm192_vm6  ;;  %v228_v39 = vsel %vm227_vm9, %v225_v31, %v226_v32  ;;  %v229_v40 = vsel %vm227_vm9, %v226_v32, %v225_v31 }
  0x1b   : > { %v196_v30 = vsel %vm194_vm8, %v195_v29, %v191_v26 }
  0x1c   : > { %v197_v33 = vsel %vm182_vm5, 0, %v196_v30 }
  0x1d   : > { %v198_v34 = vshra.s32 %v197_v33, 1  ;;  %v201_v35 = vshra.s32 %v197_v33, 2  ;;  %v204_v36 = vshra.s32 %v197_v33, 3 }
  0x1f   : > { %v199_v37 = vand.u32 1, %v198_v34  ;;  %v202_v38 = vand.u32 1, %v201_v35  ;;  %v205_v41 = vand.u32 1, %v204_v36 }
  0x21   : > { %vm200_vm10 = vcmp.eq.s32.totalorder %v199_v37, 1  ;;  %vm203_vm12 = vcmp.eq.s32.totalorder %v202_v38, 1  ;;  %vm206_vm13 = vcmp.eq.s32.totalorder %v205_v41, 1 }
  0x22   : > { %v232_v42 = vsel %vm200_vm10, %v229_v40, %v223_v27  ;;  %v233_v43 = vsel %vm200_vm10, %v228_v39, %v224_v28 }
  0x23   : > { %v234_v44 = vrot.slane %v232_v42, 4  ;;  %v235_v45 = vrot.slane %v233_v43, 4 }
  0x25   : > { %v237_v46 = vsel %vm236_vm11, %v234_v44, %v235_v45  ;;  %v238_v47 = vsel %vm236_vm11, %v235_v45, %v234_v44 }
  0x26   : > { %v241_v48 = vsel %vm203_vm12, %v238_v47, %v232_v42  ;;  %v242_v49 = vsel %vm203_vm12, %v237_v46, %v233_v43 }
  0x27   : > { %v245_v50 = vsel %vm206_vm13, %v242_v49, %v241_v48  ;;  %v246_v51 = vsel %vm206_vm13, %v241_v48, %v242_v49 }
  0x28   : > { %247 = vst [vmem:[%s147_s16] sm:$0xff] %v245_v50  ;;  %248 = vst [vmem:[%s147_s16 + $0x8] sm:$0xff] %v246_v51 }
  0x29 PF: > { %s11_s8 = sadd.s32 1, %s393_s8   ;;  %s455_s6 = smov %s389_s7 }
  0x2a   : > { %p8_p5 = scmp.ge.s32.totalorder %s11_s8, 4   ;;  %s456_s7 = smov %s458_s9 }
  0x2c   :  { %10 = sbr.rel (!%p8_p5) target bundleno = 2 (0x2), region = 54 }

</bundles_post_ra>
